<compile_context>
chip_gen: v7x
topology: tpu7x:2x2x1
jax: 0.10.0
libtpu: 0.0.40
codegen_flags: <defaults>
</compile_context>

<pallas_src>
import functools
import math

import jax
import jax.numpy as jnp
from jax import lax
from jax.experimental import pallas as pl
from jax.experimental.pallas import tpu as pltpu

_MIB = 1024 * 1024


def _round_down(x: int, m: int) -> int:
    return (x // m) * m


def _round_up(x: int, m: int) -> int:
    return ((x + m - 1) // m) * m


def _vmem_budget_bytes() -> tuple[int, int]:
    """Returns (scoped VMEM limit to request, physical per-core capacity)."""
    try:
        cap = int(getattr(pltpu.get_tpu_info(), "vmem_capacity_bytes", 64 * _MIB))
    except Exception:
        cap = 64 * _MIB  # smallest across generations (v7x) -> always a legal request
    limit = min(max(cap // 2, 32 * _MIB), 64 * _MIB)  # ~64 MiB on v5e/v6e, 32 MiB on v7x
    return limit, cap


def _sce_kernel(logits_ref, tgt_ref, loss_ref, *, alpha, beta, epsilon, compute_dtype):
    """(TILE_N, C) logits + (TILE_N, 1) int32 targets -> (TILE_N, 1) f32 loss.

    One-hot-target algebra (y one-hot at class t):
      ce  = -log(p_t + eps)
      rce = -(p_t * log1p(eps) + (1 - p_t) * log(eps))
    so the only per-element transcendental is the softmax exp; divide/log are
    per-row.  Elementwise math runs in `compute_dtype` (bf16 stays bf16 so
    v6e/v7x pack 2 elems per 32-bit lane); reductions accumulate in f32.
    """
    x = logits_ref[...].astype(compute_dtype)                   # (T, C)
    tgt = tgt_ref[...]                                          # (T, 1) int32

    m = jnp.max(x, axis=-1, keepdims=True)                      # (T, 1) row max (XLU)
    e = jnp.exp(x - m)                                          # (T, C): 1 exp/elem (EUP)

    col = lax.broadcasted_iota(jnp.int32, x.shape, 1)           # (T, C) class ids
    e_sel = jnp.where(col == tgt, e, 0.0)                       # target-class numerator
                                                                # (no one-hot float array)
    # f32 accumulation regardless of compute dtype.
    denom = jnp.sum(e, axis=-1, keepdims=True, dtype=jnp.float32)      # (T, 1)
    e_t = jnp.sum(e_sel, axis=-1, keepdims=True, dtype=jnp.float32)    # (T, 1)

    p_t = e_t / denom                                           # per-row divide only
    ce = -jnp.log(p_t + epsilon)                                # 1 log / row
    log_eps = math.log(epsilon)                                 # hoisted Python consts
    log1p_eps = math.log1p(epsilon)
    rce = -(p_t * log1p_eps + (1.0 - p_t) * log_eps)

    loss_ref[...] = (alpha * ce + beta * rce).astype(loss_ref.dtype)   # (T, 1) f32


def symmetric_cross_entropy_loss(
    logits: jax.Array,
    target_indices: jax.Array,
    *,
    num_classes: int,
    alpha: float = 1.0,
    beta: float = 1.0,
    reduction: str = "mean",
    epsilon: float = 1e-12,
    tile_n: int | None = None,
) -> jax.Array:
    """Pallas TPU implementation of SymmetricCrossEntropyLoss.forward.

    logits: (N, C) float (f32 or bf16); target_indices: (N,) int.
    Returns scalar f32 for 'mean'/'sum', or (N,) f32 for 'none'.
    """
    n, c = logits.shape
    assert c == num_classes, "logits class dim must equal num_classes"
    assert target_indices.shape == (n,)
    tgt2d = target_indices.astype(jnp.int32).reshape(n, 1)

    itemsize = jnp.dtype(logits.dtype).itemsize
    compute_dtype = jnp.bfloat16 if logits.dtype == jnp.bfloat16 else jnp.float32

    vmem_limit, vmem_cap = _vmem_budget_bytes()

    # Per-row VMEM footprint (bytes): double-buffered logits input in its own
    # dtype, ~16 B/class of in-kernel (T, C) temporaries (exp, i32 iota, select,
    # f32 reduce inputs) and ~2 KiB/row of lane padding for the double-buffered
    # (T, 1) target / loss blocks (they pad to 128 lanes in VMEM).
    per_row_bytes = c * (2 * itemsize + 16) + 2048

    if tile_n is None:
        # Biggest row tile that (with 2x headroom for compiler scratch) fits the
        # scoped VMEM limit; for typical C this puts each logits input buffer in
        # the ~2-8 MiB range that reaches the HBM roofline.
        tile_n = max(8, _round_down(vmem_limit // (2 * per_row_bytes), 8))
    tile_n = int(tile_n)

    # Guarantee at least two balanced grid steps when the batch is big enough,
    # so the "parallel" batch axis can be sharded across both v7x TensorCores.
    if n >= 128:
        tile_n = min(tile_n, _round_up(pl.cdiv(n, 2), 8))

    if tile_n >= n:
        tile_n = n                                   # single full-extent block (legal)
    else:
        tile_n = max(8, _round_down(tile_n, 8))      # sublane-aligned row tile

    # Large-C safety: raise the scoped limit if the chosen tile needs it.
    # TODO(synk): add a class-chunked (online-softmax over C) path for very large
    # vocabularies where even an 8-row tile would exceed the v7x VMEM budget.
    needed = 2 * per_row_bytes * tile_n
    if needed > vmem_limit:
        vmem_limit = min(needed, vmem_cap * 3 // 4)

    grid = (pl.cdiv(n, tile_n),)
    kernel = functools.partial(
        _sce_kernel,
        alpha=float(alpha),
        beta=float(beta),
        epsilon=float(epsilon),
        compute_dtype=compute_dtype,
    )

    cost = pl.CostEstimate(
        flops=8 * n * c,                    # max/sub/cmp/select/sums + per-row math
        transcendentals=n * c + 2 * n,      # exp per element; log + divide per row
        bytes_accessed=n * c * itemsize + 2 * n * 4,
    )

    per_row = pl.pallas_call(
        kernel,
        out_shape=jax.ShapeDtypeStruct((n, 1), jnp.float32),
        grid_spec=pltpu.PrefetchScalarGridSpec(
            num_scalar_prefetch=0,
            grid=grid,
            in_specs=[
                pl.BlockSpec((tile_n, c), lambda i: (i, 0)),   # logits tile (own dtype)
                pl.BlockSpec((tile_n, 1), lambda i: (i, 0)),   # targets tile (int32)
            ],
            out_specs=pl.BlockSpec((tile_n, 1), lambda i: (i, 0)),
        ),
        compiler_params=pltpu.CompilerParams(
            dimension_semantics=("parallel",),   # independent row tiles (2 TCs on v7x)
            vmem_limit_bytes=int(vmem_limit),
        ),
        cost_estimate=cost,
    )(logits, tgt2d)

    total = per_row[:, 0]                            # (N,) per-row SCE loss, f32
    if reduction == "mean":
        return jnp.mean(total)                       # divides by the GLOBAL N
    elif reduction == "sum":
        return jnp.sum(total)
    elif reduction == "none":
        return total
    else:
        raise ValueError("Unsupported reduction type.")


def _reference(logits, target_indices, *, num_classes, alpha, beta, epsilon, reduction):
    """Pure-JAX f32 reference mirroring the PyTorch module exactly."""
    pred_probs = jax.nn.softmax(logits.astype(jnp.float32), axis=-1)
    one_hot = jax.nn.one_hot(target_indices, num_classes, dtype=jnp.float32)
    log_pred = jnp.log(pred_probs + epsilon)
    ce = -jnp.sum(one_hot * log_pred, axis=-1)
    log_tgt = jnp.log(one_hot + epsilon)
    rce = -jnp.sum(pred_probs * log_tgt, axis=-1)
    total = alpha * ce + beta * rce
    if reduction == "mean":
        return jnp.mean(total)
    elif reduction == "sum":
        return jnp.sum(total)
    return total


if __name__ == "__main__":
    key = jax.random.PRNGKey(0)
    k1, k2, k3, k4, k5, k6 = jax.random.split(key, 6)
    eps = 1e-12

    # --- case 1: small f32 problem, single full block, 'mean' reduction ---
    N, C = 8, 32
    logits = jax.random.normal(k1, (N, C), dtype=jnp.float32)
    targets = jax.random.randint(k2, (N,), 0, C, dtype=jnp.int32)
    loss = symmetric_cross_entropy_loss(
        logits, targets, num_classes=C, alpha=1.0, beta=1.0,
        reduction="mean", epsilon=eps,
    )
    loss = jax.block_until_ready(loss)
    ref = _reference(logits, targets, num_classes=C, alpha=1.0, beta=1.0,
                     epsilon=eps, reduction="mean")
    assert jnp.allclose(loss, ref, rtol=1e-4, atol=1e-3), (loss, ref)

    # --- case 2: f32, auto tile -> 2 balanced grid steps (megacore path) ---
    N2, C2 = 256, 64
    logits2 = jax.random.normal(k3, (N2, C2), dtype=jnp.float32)
    targets2 = jax.random.randint(k4, (N2,), 0, C2, dtype=jnp.int32)
    for red in ("none", "sum"):
        out = symmetric_cross_entropy_loss(
            logits2, targets2, num_classes=C2, alpha=0.5, beta=1.0,
            reduction=red, epsilon=eps,
        )
        out = jax.block_until_ready(out)
        ref2 = _reference(logits2, targets2, num_classes=C2, alpha=0.5, beta=1.0,
                          epsilon=eps, reduction=red)
        assert jnp.allclose(out, ref2, rtol=1e-4, atol=1e-3), (red, out, ref2)

    # --- case 3: bf16 logits (bf16 compute path), multi-tile with partial edge ---
    N3, C3 = 200, 128
    logits3 = jax.random.normal(k5, (N3, C3), dtype=jnp.float32).astype(jnp.bfloat16)
    targets3 = jax.random.randint(k6, (N3,), 0, C3, dtype=jnp.int32)
    for red in ("mean", "none"):
        out = symmetric_cross_entropy_loss(
            logits3, targets3, num_classes=C3, alpha=1.0, beta=1.0,
            reduction=red, epsilon=eps, tile_n=64,   # grid=(4,), last block partial
        )
        out = jax.block_until_ready(out)
        ref3 = _reference(logits3, targets3, num_classes=C3, alpha=1.0, beta=1.0,
                          epsilon=eps, reduction=red)
        # bf16 elementwise path (f32 accumulation): bf16-level tolerance vs f32 ref.
        assert jnp.allclose(out, ref3, rtol=5e-2, atol=5e-2), (red, out, ref3)

    print("KERNEL_OK")
</pallas_src>

<mosaic_0001>
module attributes {stable_mosaic.version = 11 : i64} {
  func.func @_sce_kernel(%arg0: i32, %arg1: memref<8x32xf32, #tpu.memory_space<vmem>>, %arg2: memref<8x1xi32, #tpu.memory_space<vmem>>, %arg3: memref<8x1xf32, #tpu.memory_space<vmem>>) attributes {dimension_semantics = [#tpu.dimension_semantics<parallel>], iteration_bounds = array<i64: 1>, scalar_prefetch = 0 : i64, scratch_operands = 0 : i64, tpu.core_type = #tpu.core_type<tc>, window_params = [{transform_indices = @transform_0, window_bounds = array<i64: 8, 32>}, {transform_indices = @transform_1, window_bounds = array<i64: 8, 1>}, {transform_indices = @transform_2, window_bounds = array<i64: 8, 1>}]} {
    %c0 = arith.constant 0 : index
    %c0_0 = arith.constant 0 : index
    %0 = vector.load %arg1[%c0, %c0_0] : memref<8x32xf32, #tpu.memory_space<vmem>>, vector<8x32xf32>
    %c0_1 = arith.constant 0 : index
    %c0_2 = arith.constant 0 : index
    %1 = vector.load %arg2[%c0_1, %c0_2] : memref<8x1xi32, #tpu.memory_space<vmem>>, vector<8x1xi32>
    %cst = arith.constant dense<0xFF800000> : vector<8xf32>
    %2 = vector.multi_reduction <maximumf>, %0, %cst [1] : vector<8x32xf32> to vector<8xf32>
    %3 = vector.shape_cast %2 : vector<8xf32> to vector<8x1xf32>
    %4 = vector.broadcast %3 : vector<8x1xf32> to vector<8x32xf32>
    %5 = arith.subf %0, %4 : vector<8x32xf32>
    %6 = math.exp %5 : vector<8x32xf32>
    %7 = tpu.iota {dimensions = array<i32: 1>} : vector<8x32xi32>
    %8 = vector.broadcast %1 : vector<8x1xi32> to vector<8x32xi32>
    %9 = arith.cmpi eq, %7, %8 : vector<8x32xi32>
    %cst_3 = arith.constant 0.000000e+00 : f32
    %10 = vector.broadcast %cst_3 : f32 to vector<8x32xf32>
    %11 = arith.select %9, %6, %10 : vector<8x32xi1>, vector<8x32xf32>
    %cst_4 = arith.constant dense<0.000000e+00> : vector<8xf32>
    %12 = vector.multi_reduction <add>, %6, %cst_4 [1] : vector<8x32xf32> to vector<8xf32>
    %13 = vector.shape_cast %12 : vector<8xf32> to vector<8x1xf32>
    %cst_5 = arith.constant dense<0.000000e+00> : vector<8xf32>
    %14 = vector.multi_reduction <add>, %11, %cst_5 [1] : vector<8x32xf32> to vector<8xf32>
    %15 = vector.shape_cast %14 : vector<8xf32> to vector<8x1xf32>
    %16 = arith.divf %15, %13 : vector<8x1xf32>
    %cst_6 = arith.constant 9.99999996E-13 : f32
    %17 = vector.broadcast %cst_6 : f32 to vector<8x1xf32>
    %18 = arith.addf %16, %17 : vector<8x1xf32>
    %19 = math.log %18 : vector<8x1xf32>
    %cst_7 = arith.constant 0.000000e+00 : f32
    %20 = vector.broadcast %cst_7 : f32 to vector<8x1xf32>
    %21 = arith.subf %20, %19 : vector<8x1xf32>
    %cst_8 = arith.constant 9.99999996E-13 : f32
    %22 = vector.broadcast %cst_8 : f32 to vector<8x1xf32>
    %23 = arith.mulf %16, %22 : vector<8x1xf32>
    %cst_9 = arith.constant 1.000000e+00 : f32
    %24 = vector.broadcast %cst_9 : f32 to vector<8x1xf32>
    %25 = arith.subf %24, %16 : vector<8x1xf32>
    %cst_10 = arith.constant -27.6310215 : f32
    %26 = vector.broadcast %cst_10 : f32 to vector<8x1xf32>
    %27 = arith.mulf %25, %26 : vector<8x1xf32>
    %28 = arith.addf %23, %27 : vector<8x1xf32>
    %cst_11 = arith.constant 0.000000e+00 : f32
    %29 = vector.broadcast %cst_11 : f32 to vector<8x1xf32>
    %30 = arith.subf %29, %28 : vector<8x1xf32>
    %cst_12 = arith.constant 1.000000e+00 : f32
    %31 = vector.broadcast %cst_12 : f32 to vector<8x1xf32>
    %32 = arith.mulf %31, %21 : vector<8x1xf32>
    %cst_13 = arith.constant 1.000000e+00 : f32
    %33 = vector.broadcast %cst_13 : f32 to vector<8x1xf32>
    %34 = arith.mulf %33, %30 : vector<8x1xf32>
    %35 = arith.addf %32, %34 : vector<8x1xf32>
    %c0_14 = arith.constant 0 : index
    %c0_15 = arith.constant 0 : index
    %36 = vector.load %arg3[%c0_14, %c0_15] : memref<8x1xf32, #tpu.memory_space<vmem>>, vector<8x1xf32>
    tpu.vector_store %arg3[%c0_14, %c0_15], %35 {strides = array<i32>} : memref<8x1xf32, #tpu.memory_space<vmem>>, vector<8x1xf32>,
    return
  }
  func.func @transform_0(%arg0: i32) -> (i32, i32) {
    %c0_i32 = arith.constant 0 : i32
    %c0_i32_0 = arith.constant 0 : i32
    return %arg0, %c0_i32 : i32, i32
  }
  func.func @transform_1(%arg0: i32) -> (i32, i32) {
    %c0_i32 = arith.constant 0 : i32
    %c0_i32_0 = arith.constant 0 : i32
    return %arg0, %c0_i32 : i32, i32
  }
  func.func @transform_2(%arg0: i32) -> (i32, i32) {
    %c0_i32 = arith.constant 0 : i32
    %c0_i32_0 = arith.constant 0 : i32
    return %arg0, %c0_i32 : i32, i32
  }
}

</mosaic_0001>

<bundles_post_ra>
// kernel: tpu_custom_call.1
= control target key start
LH: loop header
LB: loop body
LE: loop exit
PB: predicated region body
PF: predicated region fallthrough
CT: control target
= control target key end

     0   :  { %vm13_vm0 = vcmask 261120   ;;  %v59_v1 = vmov 0   ;;  %v20_v7 = vlaneseq  ;;  %vm45_vm2 = vcmask 7168   ;;  %s87_s0 = inlined_call_operand.vmem [shape: f32[8,32], index: 0, kind: input, shape index: {}]   ;;  %s88_s1 = inlined_call_operand.vmem [shape: s32[8,1], index: 1, kind: input, shape index: {}]   ;;  %s89_s2 = inlined_call_operand.vmem [shape: f32[8,1], index: 2, kind: output, shape index: {}]  }
   0x1   :  { %v11_v0 = vld [vmem:[%s87_s0] sm:$0xff]  ;;  %52 = vset.pattern.permute.xlu0 %v59_v1 }
   0x2   :  { %v14_v2 = vsel %vm13_vm0, %v11_v0, -inf  ;;  %v12_v3 = vld [vmem:[%s88_s1] sm:$0xff]  ;;  %v21_v8 = vand.u32 127, %v20_v7 }
   0x3   :  { %15 = vmax.xlane.f32.xlu0 %v14_v2 }
  0x19   :  { %23 = vperm.xlu0 %52, %v12_v3  }
  0x90   :  { %v16_v4 = vpop.xlane.xlu0 %15 }
  0x91   :  { %v17_v5 = vsub.f32 %v11_v0, %v16_v4 }
  0x93   :  { %v18_v6 = vmul.f32 1.442695, %v17_v5 }
  0x95   :  { %53 = vpow2.f32 %v18_v6 }
  0x98   :  { %v24_v9 = vpop.permute.xlu0 %23 }
  0x99   :  { %vm25_vm1 = vcmp.eq.s32.totalorder %v21_v8, %v24_v9 }
  0x9f   :  { %v54_v10 = vpop.eup %53 }
  0xa0   :  { %v27_v11 = vsel %vm13_vm0, %v54_v10, 0.0  ;;  %v26_v12 = vsel %vm25_vm1, %v54_v10, 0.0 }
  0xa1   :  { %28 = vadd.xlane.f32.xlu1 %v27_v11  ;;  %v30_v13 = vsel %vm13_vm0, %v26_v12, 0.0 }
  0xa5   :  { %31 = vadd.xlane.f32.xlu1 %v30_v13 }
 0x12e   :  { %v29_v14 = vpop.xlane.xlu1 %28 }
 0x12f   :  { %55 = vrcp.f32 %v29_v14 }
 0x132   :  { %v32_v16 = vpop.xlane.xlu1 %31 }
 0x139   :  { %v56_v15 = vpop.eup %55 }
 0x13a   :  { %v34_v17 = vmul.f32 %v56_v15, %v32_v16 }
 0x13c   :  { %v35_v18 = vadd.f32 1e-12, %v34_v17  ;;  %v40_v19 = vsub.f32 1.0, %v34_v17  ;;  %v39_v21 = vmul.f32 1e-12, %v34_v17 }
 0x13e   :  { %57 = vlog2.f32 %v35_v18  ;;  %v41_v20 = vmul.f32 -27.631021, %v40_v19 }
 0x140   :  { %v42_v22 = vadd.f32 %v41_v20, %v39_v21 }
 0x142   :  { %v43_v26 = vsub.f32 0.0, %v42_v22 }
 0x148   :  { %v58_v23 = vpop.eup %57 }
 0x149   :  { %v37_v24 = vmul.f32 0.6931472, %v58_v23 }
 0x14b   :  { %v38_v25 = vsub.f32 0.0, %v37_v24 }
 0x14d   :  { %v44_v27 = vadd.f32 %v43_v26, %v38_v25 }
 0x14f   :  { %46 = vst.msk [vmem:[%s89_s2] sm:$0xff] %vm45_vm2, %v44_v27 }

</bundles_post_ra>
